<compile_context>
chip_gen: v6e
topology: v6e:2x2x1
jax: 0.10.0
libtpu: 0.0.40
codegen_flags: <defaults>
</compile_context>

<pallas_src>
import functools

import jax
import jax.numpy as jnp
from jax.experimental import pallas as pl
from jax.experimental.pallas import tpu as pltpu


def _cdiv(a, b):
    return -(-a // b)


def _addcoords_kernel(x_ref, coord_ref, o_ref, *, C, tc, n_extra, n_in_c, n_c):
    """One (1, tc, ts) output tile.

    x_ref     : (1, tc, ts)  feature channels (edge blocks may be padded)
    coord_ref : (sub, ts)    precomputed xx / yy (/ rr) rows, sublane padded
    o_ref     : (1, tc, ts)  output tile
    """
    jc = pl.program_id(2)          # output-channel tile index

    # Streaming copy of the feature channels.  A pure-coordinate tail tile
    # (only exists when n_c > n_in_c) skips the copy entirely: every valid
    # output row of that tile is overwritten below, and rows >= C_out are
    # dropped by the partial-block writeback anyway.
    if n_c > n_in_c:
        @pl.when(jc < n_in_c)
        def _copy():
            o_ref[...] = x_ref[...]
    else:
        o_ref[...] = x_ref[...]

    # Overwrite the coordinate rows.  Which channel tile owns each coordinate
    # channel -- and its row offset inside that tile -- is static, so these
    # are plain static-sliced stores of <= n_extra sublane rows, gated by a
    # cheap scalar compare on the tile index.  Pure-copy tiles skip them.
    groups = {}
    for k in range(n_extra):
        groups.setdefault((C + k) // tc, []).append(k)
    for jk, ks in groups.items():
        k0, nk = ks[0], len(ks)
        row0 = (C + k0) - jk * tc          # static local row of first coord ch

        def _write(k0=k0, nk=nk, row0=row0):
            o_ref[:, row0:row0 + nk, :] = coord_ref[k0:k0 + nk, :][None]

        if n_c == 1:
            _write()                       # only one channel tile: always runs
        else:
            pl.when(jc == jk)(_write)


def _choose_tiles(C_out, S, itemsize, sub, target_bytes):
    """Pick (channel_tile, spatial_tile).

    Prefer fully contiguous rows (ts == S) and shrink the channel tile first;
    only split the spatial axis when even the minimum channel tile exceeds the
    block budget.  tc is a multiple of the dtype-native sublane count `sub`.
    """
    row_bytes = max(S * itemsize, 1)
    tc_cap = _cdiv(C_out, sub) * sub                    # full extent, padded
    tc = min(tc_cap, max(sub, (target_bytes // row_bytes) // sub * sub))
    if tc * row_bytes <= 2 * target_bytes:
        ts = S                                          # full lane-dense rows
    else:
        tc = sub
        ts = (target_bytes // (tc * itemsize)) // 128 * 128
        ts = min(max(128, ts), S)
    return int(tc), int(ts)


def _add_coords_pallas(feats, with_radius, target_block_bytes):
    B, C, H, W = feats.shape
    S = H * W
    n_extra = 3 if with_radius else 2
    C_out = C + n_extra
    dt = feats.dtype
    itemsize = jnp.dtype(dt).itemsize
    sub = max(8, 32 // itemsize)       # sublane rows/vreg: 8 f32, 16 bf16, 32 i8

    # Keep the per-block budget in the measured sweet spot (and VMEM-safe on
    # every generation) even if the caller passes something extreme.
    target_bytes = max(min(int(target_block_bytes), 8 << 20), 1 << 12)

    # Batch-invariant coordinate planes, built once in float32 and cast once.
    # Padded to a full sublane tile so the coord block loads unmasked.
    hh = jnp.arange(H, dtype=jnp.float32)
    ww = jnp.arange(W, dtype=jnp.float32)
    xx = jnp.broadcast_to((hh / (H - 1) * 2.0 - 1.0)[:, None], (H, W)).reshape(S)
    yy = jnp.broadcast_to((ww / (W - 1) * 2.0 - 1.0)[None, :], (H, W)).reshape(S)
    planes = [xx, yy]
    if with_radius:
        planes.append(jnp.sqrt((xx - 0.5) ** 2 + (yy - 0.5) ** 2))
    planes += [jnp.zeros((S,), jnp.float32)] * (sub - len(planes))
    coords = jnp.stack(planes, axis=0).astype(dt)       # (sub, S)

    tc, ts = _choose_tiles(C_out, S, itemsize, sub, target_bytes)
    n_c = _cdiv(C_out, tc)
    n_in_c = _cdiv(C, tc)
    n_s = _cdiv(S, ts)

    # v7x megacore shards the parallel (batch, spatial) axes; if they collapse
    # to a single unit of work, split the spatial axis so both cores get work.
    if B * n_s == 1 and ts == S and S % 256 == 0:
        ts = S // 2
        n_s = 2

    x_flat = feats.reshape(B, C, S)                     # free contiguous reshape

    # Explicit scoped-VMEM budget: double-buffered input + output + coord
    # blocks plus headroom.  ~12-16 MiB at the default 2 MiB block budget, so
    # it fits the v5e 16 MiB scoped default and stays well under v7x's
    # 64 MiB-per-TC physical VMEM.
    block_bytes = tc * ts * itemsize
    coord_bytes = sub * ts * itemsize
    vmem_limit = 2 * (2 * block_bytes + coord_bytes) + (4 << 20)
    vmem_limit = int(min(max(vmem_limit, 16 << 20), 48 << 20))

    kernel = functools.partial(
        _addcoords_kernel, C=C, tc=tc, n_extra=n_extra, n_in_c=n_in_c, n_c=n_c)

    out_flat = pl.pallas_call(
        kernel,
        out_shape=jax.ShapeDtypeStruct((B, C_out, S), dt),
        grid_spec=pltpu.PrefetchScalarGridSpec(
            num_scalar_prefetch=0,
            grid=(B, n_s, n_c),
            in_specs=[
                # Clamp the channel block index so coordinate-tail tiles reuse
                # the previously fetched feature block (same block index =>
                # Pallas skips the re-fetch, no extra input DMA).
                pl.BlockSpec(
                    (1, tc, ts),
                    lambda b, js, jc: (b, jnp.minimum(jc, n_in_c - 1), js)),
                # Coordinate rows: one tiny sublane-aligned block shared by all
                # batch / channel tiles of a given spatial tile.
                pl.BlockSpec((sub, ts), lambda b, js, jc: (0, js)),
            ],
            out_specs=pl.BlockSpec((1, tc, ts), lambda b, js, jc: (b, jc, js)),
        ),
        compiler_params=pltpu.CompilerParams(
            # Channel axis stays "arbitrary": it carries the clamped-index DMA
            # reuse and the slow(er) coordinate tiles; megacore shards over
            # batch / spatial only (no-op on v5e/v6e, balanced on v7x).
            dimension_semantics=("parallel", "parallel", "arbitrary"),
            vmem_limit_bytes=vmem_limit),
    )(x_flat, coords)

    return out_flat.reshape(B, C_out, H, W)


def add_coords(feats: jax.Array, with_radius: bool = False, *,
               use_pallas: bool | None = None,
               target_block_bytes: int = 2 << 20) -> jax.Array:
    """AddCoords.forward (NCHW): append xx / yy (/ rr) coordinate channels."""
    _, C, H, W = feats.shape
    if use_pallas is None:
        # Below ~64K elements per image the per-step / launch overhead of the
        # kernel dominates; a plain XLA concat+broadcast is at least as fast.
        use_pallas = C * H * W >= (1 << 16)
    if not use_pallas:
        return _reference(feats, with_radius)
    return _add_coords_pallas(feats, with_radius, target_block_bytes)


def _reference(feats: jnp.ndarray, with_radius: bool = False) -> jnp.ndarray:
    """Pure-JAX reference mirroring the PyTorch semantics."""
    B, C, H, W = feats.shape
    h = jnp.arange(H, dtype=jnp.float32)
    w = jnp.arange(W, dtype=jnp.float32)
    xx = jnp.broadcast_to((h / (H - 1) * 2.0 - 1.0)[:, None], (H, W))
    yy = jnp.broadcast_to((w / (W - 1) * 2.0 - 1.0)[None, :], (H, W))
    xx_b = jnp.broadcast_to(xx[None, None], (B, 1, H, W))
    yy_b = jnp.broadcast_to(yy[None, None], (B, 1, H, W))
    out = jnp.concatenate(
        [feats, xx_b.astype(feats.dtype), yy_b.astype(feats.dtype)], axis=1)
    if with_radius:
        rr = jnp.sqrt((xx_b - 0.5) ** 2 + (yy_b - 0.5) ** 2)
        out = jnp.concatenate([out, rr.astype(feats.dtype)], axis=1)
    return out


if __name__ == "__main__":
    key = jax.random.PRNGKey(0)

    # Small shape consistent with the module; force the Pallas path so the
    # kernel itself is compiled and executed.
    B, C, H, W = 2, 4, 16, 16
    feats = jax.random.normal(key, (B, C, H, W), dtype=jnp.float32)

    out = add_coords(feats, with_radius=False, use_pallas=True)
    jax.block_until_ready(out)
    ref = _reference(feats, with_radius=False)
    assert out.shape == (B, C + 2, H, W)
    assert jnp.allclose(out, ref, atol=1e-6), "mismatch (with_radius=False)"

    out_r = add_coords(feats, with_radius=True, use_pallas=True)
    jax.block_until_ready(out_r)
    ref_r = _reference(feats, with_radius=True)
    assert out_r.shape == (B, C + 3, H, W)
    assert jnp.allclose(out_r, ref_r, atol=1e-6), "mismatch (with_radius=True)"

    # Multi-tile paths (tiny block budget so small test shapes still tile):
    #   C=24: dedicated coordinate-only tail tile (copy skipped, input DMA reused)
    #   C=20: mixed feature/coordinate tile with a padded-edge input block
    #   C=7 : coordinate channels spanning TWO channel tiles
    for C2 in (24, 20, 7):
        feats2 = jax.random.normal(jax.random.PRNGKey(1), (2, C2, 16, 16),
                                   dtype=jnp.float32)
        out2 = add_coords(feats2, with_radius=True, use_pallas=True,
                          target_block_bytes=4096)
        jax.block_until_ready(out2)
        assert jnp.allclose(out2, _reference(feats2, with_radius=True),
                            atol=1e-6), f"mismatch (tiled, C={C2})"

    # bf16: dtype-aware sublane rounding (tc multiple of 16, coords padded to 16).
    feats_bf = jax.random.normal(
        jax.random.PRNGKey(2), (B, C, H, W)).astype(jnp.bfloat16)
    out_bf = add_coords(feats_bf, with_radius=True, use_pallas=True)
    jax.block_until_ready(out_bf)
    assert jnp.allclose(out_bf.astype(jnp.float32),
                        _reference(feats_bf, with_radius=True).astype(jnp.float32),
                        atol=1e-2), "mismatch (bf16)"

    # Default (auto) path: tiny shapes fall back to plain XLA and stay
    # consistent with the reference.
    out_auto = add_coords(feats, with_radius=False)
    assert jnp.allclose(out_auto, ref, atol=1e-6), "mismatch (auto fallback)"

    print("KERNEL_OK")
</pallas_src>

<mosaic_0001>
module attributes {stable_mosaic.version = 11 : i64} {
  func.func @_addcoords_kernel(%arg0: i32, %arg1: i32, %arg2: i32, %arg3: memref<1x8x256xf32, #tpu.memory_space<vmem>>, %arg4: memref<8x256xf32, #tpu.memory_space<vmem>>, %arg5: memref<1x8x256xf32, #tpu.memory_space<vmem>>) attributes {dimension_semantics = [#tpu.dimension_semantics<parallel>, #tpu.dimension_semantics<parallel>, #tpu.dimension_semantics<arbitrary>], iteration_bounds = array<i64: 2, 1, 1>, scalar_prefetch = 0 : i64, scratch_operands = 0 : i64, tpu.core_type = #tpu.core_type<tc>, window_params = [{transform_indices = @transform_0, window_bounds = array<i64: 1, 8, 256>}, {transform_indices = @transform_1, window_bounds = array<i64: 8, 256>}, {transform_indices = @transform_2, window_bounds = array<i64: 1, 8, 256>}]} {
    %c0 = arith.constant 0 : index
    %c0_0 = arith.constant 0 : index
    %c0_1 = arith.constant 0 : index
    %0 = vector.load %arg3[%c0, %c0_0, %c0_1] : memref<1x8x256xf32, #tpu.memory_space<vmem>>, vector<1x8x256xf32>
    %c0_2 = arith.constant 0 : index
    %c0_3 = arith.constant 0 : index
    %c0_4 = arith.constant 0 : index
    %1 = vector.load %arg5[%c0_2, %c0_3, %c0_4] : memref<1x8x256xf32, #tpu.memory_space<vmem>>, vector<1x8x256xf32>
    tpu.vector_store %arg5[%c0_2, %c0_3, %c0_4], %0 {strides = array<i32>} : memref<1x8x256xf32, #tpu.memory_space<vmem>>, vector<1x8x256xf32>,
    %c0_5 = arith.constant 0 : index
    %c0_6 = arith.constant 0 : index
    %2 = vector.load %arg4[%c0_5, %c0_6] : memref<8x256xf32, #tpu.memory_space<vmem>>, vector<2x256xf32>
    %3 = vector.shape_cast %2 : vector<2x256xf32> to vector<1x2x256xf32>
    %c0_7 = arith.constant 0 : index
    %c4 = arith.constant 4 : index
    %c0_8 = arith.constant 0 : index
    %4 = vector.load %arg5[%c0_7, %c4, %c0_8] : memref<1x8x256xf32, #tpu.memory_space<vmem>>, vector<1x2x256xf32>
    tpu.vector_store %arg5[%c0_7, %c4, %c0_8], %3 {strides = array<i32>} : memref<1x8x256xf32, #tpu.memory_space<vmem>>, vector<1x2x256xf32>,
    return
  }
  func.func @transform_0(%arg0: i32, %arg1: i32, %arg2: i32) -> (i32, i32, i32) {
    %c0_i32 = arith.constant 0 : i32
    %0 = arith.minsi %arg2, %c0_i32 : i32
    %c0_i32_0 = arith.constant 0 : i32
    return %arg0, %0, %arg1 : i32, i32, i32
  }
  func.func @transform_1(%arg0: i32, %arg1: i32, %arg2: i32) -> (i32, i32) {
    %c0_i32 = arith.constant 0 : i32
    %c0_i32_0 = arith.constant 0 : i32
    return %c0_i32, %arg1 : i32, i32
  }
  func.func @transform_2(%arg0: i32, %arg1: i32, %arg2: i32) -> (i32, i32, i32) {
    %c0_i32 = arith.constant 0 : i32
    return %arg0, %arg2, %arg1 : i32, i32, i32
  }
}

</mosaic_0001>

<bundles_post_ra>
// kernel: tpu_custom_call.1
= control target key start
LH: loop header
LB: loop body
LE: loop exit
PB: predicated region body
PF: predicated region fallthrough
CT: control target
= control target key end

     0   :  { %7 = vsyncpa [#allocation3], 0  ;;  %s717_s0 = inlined_call_operand.hbm [shape: f32[2,4,256], index: 0, kind: input, shape index: {}]   ;;  %s718_s1 = inlined_call_operand.hbm [shape: f32[8,256], index: 1, kind: input, shape index: {}]   ;;  %s719_s2 = inlined_call_operand.vmem [shape: f32[2,6,256], index: 2, kind: output, shape index: {}]  }
   0x1   :  { %9 = vsyncpa [#allocation3 + $0x1], 0 }
   0x2   :  { %10 = vsyncpa [#allocation5], 0  ;;  %s606_s9 = smov 0   ;;  %s608_s10 = smov 0  }
   0x3   :  { %s610_s11 = smov 0   ;;  %s612_s12 = smov 0  }
   0x4   :  { %s614_s13 = smov 0   ;;  %s616_s14 = smov 0  }
   0x5 LB: > { %s401_s15 = sadd.s32 4294967295, %s585_s14   ;;  %s35_s16 = sadd.s32 1, %s581_s13  ;;  %s585_s14 = sphi %s616_s14, %s16_s14   ;;  %s581_s13 = sphi %s614_s13, %s730_s13   ;;  %s577_s12 = sphi %s612_s12, %s729_s12   ;;  %s573_s11 = sphi %s610_s11, %s728_s11   ;;  %s569_s10 = sphi %s608_s10, %s727_s10   ;;  %s565_s9 = sphi %s606_s9, %s726_s9  }
   0x6   : > { %p37_p0 = scmp.ge.s32.totalorder %s35_s16, 2  ;;  %s50_s17 = sadd.s32 1, %s573_s11 }
   0x7   : > { %p57_p1 = scmp.ne.s32.totalorder %s573_s11, %s569_s10  ;;  %p58_p2 = scmp.eq.s32.totalorder %s585_s14, 0 }
   0x8   : > { %s732_s16 = smov (%p37_p0, %s35_s16), 0  ;;  %p63_p4 = scmp.ne.s32.totalorder %s569_s10, %s565_s9 }
   0x9   : > { %p642_p3 = por %p58_p2, %p57_p1  ;;  %s43_s19 = ssub.s32 %s581_s13, %s732_s16 }
   0xa   : > { %p649_p5 = scmp.eq.s32.totalorder %s401_s15, 0  ;;  %p48_p6 = scmp.eq.s32.totalorder %s43_s19, 0 }
   0xb   : > { %p403_p7 = scmp.ge.s32.totalorder %s585_s14, 1  ;;  %p130_p9 = scmp.lt.s32.totalorder %s585_s14, 3 }
   0xc   : > { %p656_p8 = por %p649_p5, %p63_p4  ;;  %s587_s24 = smov [#allocation4]  }
   0xd   : > { %s662_s22 = scalar_select %p48_p6, %s573_s11, %s50_s17  }
   0xe   : > { %s723_s21 = scalar_select %p656_p8, 1, 0 }
   0xf   : > { %p664_p10 = pnand %p403_p7, %p130_p9  ;;  %s146_s25 = sshll.u32 %s587_s24, 4  ;;  %s147_s25 = int_to_ptr.vmem [resolvable:$true] %s146_s25 }
  0x10   : > { %s494_s26 = scalar_lea.vmem %s147_s25, 256  ;;  %p502_p4 = scmp.lt.s32.totalorder %s147_s25, %s147_s25 }
  0x11   : > { %p423_p11 = pneg %p664_p10  ;;  %p495_p0 = scmp.ne.s32.totalorder %s147_s25, %s494_s26 }
  0x12   : > { %p503_p6 = scmp.lt.s32.totalorder %s494_s26, %s494_s26 }
  0x13   : > { %p424_p12 = pnand %p423_p11, %p649_p5 }
  0x14   : > { %p504_p8 = por %p503_p6, %p502_p4 }
  0x15   : > { %p485_p13 = pneg %p424_p12 }
  0x17   : > { %p497_p1 = pnand %p495_p0, %p485_p13 }
  0x19   : > { %p498_p2 = pneg %p497_p1 }
  0x1b   : > { %p505_p7 = pnand %p504_p8, %p498_p2 }
  0x1d   : > { %508 = shalt.err (!%p505_p7)
}
  0x1e   : > { %426 = dma.hbm_to_vmem [thread:$0]  (!%p424_p12), %s718_s1, 256, %s147_s25, [#allocation5]  }
  0x1f   : > { %p405_p9 = scmp.ge.s32.totalorder %s585_s14, 2 }
  0x21   : > { %153 = sbr.rel (%p405_p9) target bundleno = 57 (0x39), region = 20 }
  0x26   : > { %156 = sbr.rel (!%p642_p3) target bundleno = 57 (0x39), region = 24  ;;  %s157_s29 = sand.u32 (%p642_p3), 1, %s573_s11  }
  0x27   : > { %s406_s30 = sshll.u32 (%p642_p3), %s157_s29, 4  ;;  %s158_s3 = scalar_lea.sflag (%p642_p3), [#allocation3], %s157_s29 }
  0x28   : > { %s161_s4 = scalar_lea.vmem (%p642_p3), [#allocation2], %s406_s30 }
  0x2b   : > { %171 = vsyncadd %s158_s3, 128  ;;  %s416_s5 = sshll.u32 %s581_s13, 7  ;;  %s180_s6 = sshll.u32 %s161_s4, 4  ;;  %s181_s6 = int_to_ptr.vmem [resolvable:$true] %s180_s6 }
  0x2c   : > { %s178_s9 = scalar_lea.hbm %s717_s0, %s416_s5  ;;  %s519_s15 = scalar_lea.vmem %s181_s6, 128 }
  0x2d   : > { %p520_p8 = scmp.ne.s32.totalorder %s181_s6, %s519_s15  ;;  %s588_s17 = smov [#allocation2]  }
  0x2e   : > { %s521_s19 = sshll.u32 %s588_s17, 4  ;;  %s522_s19 = int_to_ptr.vmem [resolvable:$false] %s521_s19 }
  0x2f   : > { %s523_s18 = scalar_lea.vmem %s522_s19, 512  ;;  %p524_p3 = scmp.lt.s32.totalorder %s181_s6, %s522_s19 }
  0x30   : > { %p525_p11 = scmp.lt.s32.totalorder %s523_s18, %s519_s15 }
  0x32   : > { %p526_p12 = por %p525_p11, %p524_p3 }
  0x34   : > { %p527_p13 = pnand %p526_p12, %p520_p8 }
  0x36   : > { %530 = shalt.err (!%p527_p13)
}
  0x37   : > { %s589_s24 = smov 128   ;;  %s590_s25 = smov 8  }
  0x38   : > { %186 = dma.hbm_to_vmem [thread:$0]  %s178_s9, 128, %s181_s6, %s158_s3, %s589_s24, %s589_s24, %s590_s25  }
  0x39 PF: > { %192 = sbr.rel (%p664_p10) target bundleno = 72 (0x48), region = 28  ;;  %s194_s26 = sand.u32 (!%p664_p10), 1, %s569_s10  }
  0x3a   : > { %s410_s27 = sshll.u32 (!%p664_p10), %s194_s26, 4  ;;  %s195_s28 = scalar_lea.sflag (!%p664_p10), [#allocation3], %s194_s26 }
  0x3b   : > { %s198_s29 = scalar_lea.vmem (!%p664_p10), [#allocation2], %s410_s27  ;;  %p725_p0 = scmp.ne.s32.totalorder (!%p664_p10), %s723_s21, 0 }
  0x3e   : > { %556 = dma.done.wait (%p725_p0), %s195_s28, 256  }
  0x3f   : > { %558 = vsyncadd (%p725_p0), %s195_s28, 4294967040 }
  0x40   : > { %560 = dma.done.wait (%p649_p5), [#allocation5], 256  }
  0x41   : > { %562 = vsyncadd (%p649_p5), [#allocation5], 4294967040  ;;  %p240_p10 = scmp.lt.s32.totalorder %s577_s12, 1  ;;  %v480_v0 = vld [vmem:[%s198_s29] ss:$8 sps:$4 sm:$0xff]  }
  0x42   : > { %v482_v1 = vld [vmem:[%s198_s29 + $0x4] ss:$8 sps:$4 sm:$0xff]   ;;  %v263_v2 = vld [vmem:[#allocation4] sm:$0x3]  ;;  %v264_v3 = vld [vmem:[#allocation4 + $0x8] sm:$0x3] }
  0x43   : > { %s734_s12 = smov (!%p240_p10, %s577_s12), 1  ;;  %v267_v4 = vrot.slane %v263_v2, 4  ;;  %v268_v5 = vrot.slane %v264_v3, 4 }
  0x44   : > { %s417_s23 = sshll.u32 %s734_s12, 4 }
  0x45   : > { %s251_s4 = scalar_lea.vmem %s719_s2, %s417_s23 }
  0x46   : > { %261 = vst [vmem:[%s251_s4] sm:$0xff] %v480_v0  ;;  %262 = vst [vmem:[%s251_s4 + $0x8] sm:$0xff] %v482_v1 }
  0x47   : > { %271 = vst [vmem:[%s251_s4] sm:$0x30] %v267_v4  ;;  %272 = vst [vmem:[%s251_s4 + $0x8] sm:$0x30] %v268_v5 }
  0x48 PF: > { %s16_s14 = sadd.s32 1, %s585_s14   ;;  %s726_s9 = smov %s569_s10 }
  0x49   : > { %p13_p5 = scmp.ge.s32.totalorder %s16_s14, 4   ;;  %s727_s10 = smov %s573_s11 }
  0x4a   : > { %s728_s11 = smov %s662_s22  ;;  %s729_s12 = smov %s581_s13 }
  0x4b   : > { %s730_s13 = smov %s732_s16  ;;  %15 = sbr.rel (!%p13_p5) target bundleno = 5 (0x5), region = 73 }
  0x50   :  { %311 = vsyncpa [#allocation3], 1 }
  0x51   :  { %313 = vsyncpa [#allocation3 + $0x1], 1 }
  0x52   :  { %314 = vsyncpa [#allocation5], 1 }

</bundles_post_ra>
